<compile_context>
chip_gen: v7x
topology: tpu7x:2x2x1
jax: 0.10.0
libtpu: 0.0.40
codegen_flags: <defaults>
</compile_context>

<pallas_src>
import jax
import jax.numpy as jnp
from jax.experimental import pallas as pl
from jax.experimental.pallas import tpu as pltpu


# --------------------------------------------------------------------------
# Kernel
# --------------------------------------------------------------------------
def _make_ensemble_kernel(n_layers):
    """n_layers = number of Linear layers per head (>= 2).

    Kernel refs (in order):
      sa_ref   (D, TB)                      -- [obs;act]^T activation slab
      w0_t (KH1, D),  b0 (KH1, 1)
      [w_l_t (KH_{l+1}, KH_l), b_l (KH_{l+1}, 1)]  for each middle layer
      w_last_t (K_pad, KH_last), b_last (K_pad, 1)
      out_ref  (K_pad, TB)
    """

    def kernel(sa_ref, *refs):
        out_ref = refs[-1]
        p = refs[:-1]

        # Layer 0: h^T = W0^T @ sa^T + b0  (features on sublanes, batch on lanes)
        h = jnp.dot(p[0][...], sa_ref[...],
                    preferred_element_type=jnp.float32) + p[1][...]
        h = jnp.maximum(h, 0.0)

        # Middle hidden layers (block-diagonal fused weights) + ReLU.
        idx = 2
        for _ in range(n_layers - 2):
            h = jnp.dot(p[idx][...], h,
                        preferred_element_type=jnp.float32) + p[idx + 1][...]
            h = jnp.maximum(h, 0.0)
            idx += 2

        # Final layer -> (K_pad, TB): plain matmul, lane-dense store.
        q = jnp.dot(p[idx][...], h,
                    preferred_element_type=jnp.float32) + p[idx + 1][...]
        out_ref[...] = q.astype(out_ref.dtype)

    return kernel


# --------------------------------------------------------------------------
# Wrapper helpers
# --------------------------------------------------------------------------
def _round_up(x, m):
    return (x + m - 1) // m * m


def _num_tensorcores_per_chip():
    """Heuristic: 2 TCs on v4/v5p (megacore) and v7x; 1 on v5e/v6e."""
    try:
        kind = jax.devices()[0].device_kind.lower()
    except Exception:
        return 1
    if "v7" in kind:
        return 2
    if "v4" in kind or "v5p" in kind:
        return 2
    return 1


def _fuse_heads_transposed(heads, k_pad):
    """Fuse per-head params into one wide / block-diagonal set, stored
    transposed so every layer is h^T = W^T @ h_prev^T.

    Returns [w0_t, b0, w1_t, b1, ..., w_last_t, b_last] with weights of shape
    (out_l, in_l) and biases (out_l, 1).  The last layer is zero-padded from K
    rows to k_pad rows (multiple of 8) for an unmasked sublane store.
    """
    n_layers = len(heads[0])
    K = len(heads)
    assert n_layers >= 2, "expect at least one hidden layer"

    fused = []
    # Layer 0: concat over heads along the output axis.
    w0 = jnp.concatenate([h[0][0] for h in heads], axis=1)            # (D, K*H1)
    b0 = jnp.concatenate([h[0][1] for h in heads], axis=0)            # (K*H1,)
    fused += [w0.T, b0[:, None]]

    # Middle hidden layers: block-diagonal.
    for l in range(1, n_layers - 1):
        wl = jax.scipy.linalg.block_diag(*[h[l][0] for h in heads])   # (KHl, KHl+1)
        bl = jnp.concatenate([h[l][1] for h in heads], axis=0)
        fused += [wl.T, bl[:, None]]

    # Last layer: per-head (H, 1) columns -> block-diag (K*H, K), transposed
    # to (K, K*H) and padded to (k_pad, K*H).
    w_last = jax.scipy.linalg.block_diag(*[h[-1][0] for h in heads])  # (K*H, K)
    b_last = jnp.concatenate([h[-1][1] for h in heads], axis=0)       # (K,)
    w_last_t = w_last.T
    b_last_t = b_last[:, None]
    if k_pad > K:
        w_last_t = jnp.pad(w_last_t, ((0, k_pad - K), (0, 0)))
        b_last_t = jnp.pad(b_last_t, ((0, k_pad - K), (0, 0)))
    fused += [w_last_t, b_last_t]
    return fused


# --------------------------------------------------------------------------
# Wrapper
# --------------------------------------------------------------------------
def ensemble_double_q_forward(obs, act, heads, *, batch_tile=None,
                              compute_dtype=None):
    """Returns (q1_list, q2_list), each a list of num_q arrays of shape (B,)."""
    B, obs_dim = obs.shape
    B2, act_dim = act.shape
    assert B == B2
    D = obs_dim + act_dim
    K = len(heads)                          # = 2 * num_q heads total
    n_layers = len(heads[0])
    assert heads[0][0][0].shape[0] == D

    K_pad = _round_up(K, 8)
    fused = _fuse_heads_transposed(heads, K_pad)
    if compute_dtype is not None:
        fused = [p.astype(compute_dtype) for p in fused]

    # -------- resident-parameter VMEM guard ---------------------------------
    # Params are kept fully resident (constant index_map); worst case 2x for
    # the pipeline's buffering.
    param_bytes = 2 * sum(int(p.size) * p.dtype.itemsize for p in fused)
    # TODO(synk): if the fused block-diagonal weights outgrow VMEM (large
    # num_q * hidden), tile the fused hidden dimension / iterate heads on an
    # extra grid axis instead of keeping everything resident.
    assert param_bytes <= (12 << 20), (
        f"fused ensemble weights too large to stay resident in VMEM "
        f"({param_bytes} bytes); reduce num_q/hidden_sizes or add head tiling")

    # -------- batch tiling: batch lives on the 128-lane axis ----------------
    widths = [w.shape[0] for w in fused[::2]]         # per-layer output rows
    B_lane = _round_up(B, 128)
    if batch_tile is None:
        budget = (16 << 20) - param_bytes             # conservative, v5e-safe
        # live f32 rows per lane: 2x input (double-buffered) + 2 hidden
        # activation slabs + 2x output (double-buffered)
        act_rows = 2 * _round_up(D, 8) + 2 * max(widths[:-1]) + 2 * K_pad
        cap = max(128, (budget // (4 * act_rows)) // 128 * 128)
        cap = min(cap, 2048)
        batch_tile = min(B_lane, cap)
        # On 2-TensorCore chips make sure the "parallel" batch axis has >= 2
        # steps so both cores get work.
        n_tc = _num_tensorcores_per_chip()
        if n_tc > 1 and B_lane >= n_tc * 128:
            batch_tile = min(batch_tile, _round_up(pl.cdiv(B_lane, n_tc), 128))
    assert batch_tile % 128 == 0, "batch_tile must be a multiple of 128"
    B_pad = _round_up(B_lane, batch_tile)
    grid = B_pad // batch_tile

    # -------- input prep: one (D, B_pad) activation slab ---------------------
    sa_t = jnp.concatenate([obs, act], axis=-1).T      # (D, B)
    if compute_dtype is not None:
        sa_t = sa_t.astype(compute_dtype)
    if B_pad != B:
        sa_t = jnp.pad(sa_t, ((0, 0), (0, B_pad - B)))

    # -------- specs ----------------------------------------------------------
    in_specs = [pl.BlockSpec((D, batch_tile), lambda i: (0, i))]
    # Parameters: full-array blocks with a constant index_map -> DMA'd once,
    # resident in VMEM across all grid steps.
    in_specs += [pl.BlockSpec(p.shape, lambda i: (0, 0)) for p in fused]
    out_spec = pl.BlockSpec((K_pad, batch_tile), lambda i: (0, i))  # lane-dense

    # -------- advisory cost estimate -----------------------------------------
    flops = 2 * B_pad * sum(w.shape[0] * w.shape[1] for w in fused[::2])
    bytes_accessed = (int(sa_t.size) * sa_t.dtype.itemsize
                      + sum(int(p.size) * p.dtype.itemsize for p in fused)
                      + 4 * K_pad * B_pad)
    cost = pl.CostEstimate(flops=int(flops), transcendentals=0,
                           bytes_accessed=int(bytes_accessed))

    out = pl.pallas_call(
        _make_ensemble_kernel(n_layers),
        out_shape=jax.ShapeDtypeStruct((K_pad, B_pad), jnp.float32),
        grid_spec=pltpu.PrefetchScalarGridSpec(
            num_scalar_prefetch=0,
            grid=(grid,),
            in_specs=in_specs,
            out_specs=out_spec,
        ),
        compiler_params=pltpu.CompilerParams(
            dimension_semantics=("parallel",),
            vmem_limit_bytes=32 * 1024 * 1024),
        cost_estimate=cost,
    )(sa_t, *fused)

    out = out[:K, :B]                 # drop head + batch padding
    num_q = K // 2
    q1_list = [out[i] for i in range(num_q)]
    q2_list = [out[num_q + i] for i in range(num_q)]
    return q1_list, q2_list


def ensemble_double_q_predict(obs, act, heads, **kw):
    """Mirrors EnsembleDoubleQCritic.predict (min over the ensemble)."""
    q1_list, q2_list = ensemble_double_q_forward(obs, act, heads, **kw)
    qs1_min = jnp.min(jnp.stack(q1_list), axis=0)
    qs2_min = jnp.min(jnp.stack(q2_list), axis=0)
    return qs1_min, qs2_min, q1_list, q2_list


# --------------------------------------------------------------------------
# Params / reference
# --------------------------------------------------------------------------
def init_ensemble_params(key, obs_dim, act_dim, hidden_sizes, num_q=2):
    """heads[k] = list of (W (in,out), b (out,)) per layer; nn.Linear-style init.

    Heads 0..num_q-1 are q1_nets, heads num_q..2*num_q-1 are q2_nets.
    """
    sizes = [obs_dim + act_dim] + list(hidden_sizes) + [1]
    K = 2 * num_q
    heads = []
    for hk in jax.random.split(key, K):
        layers = []
        for lk, fi, fo in zip(jax.random.split(hk, len(sizes) - 1),
                              sizes[:-1], sizes[1:]):
            kw, kb = jax.random.split(lk)
            bound = 1.0 / (fi ** 0.5)
            w = jax.random.uniform(kw, (fi, fo), jnp.float32, -bound, bound)
            b = jax.random.uniform(kb, (fo,), jnp.float32, -bound, bound)
            layers.append((w, b))
        heads.append(layers)
    return heads


def ensemble_double_q_ref(obs, act, heads):
    """Pure-JAX reference of EnsembleDoubleQCritic.forward."""
    sa = jnp.concatenate([obs, act], axis=-1)

    def run(layers):
        h = sa
        for li, (w, b) in enumerate(layers):
            h = h @ w + b
            if li < len(layers) - 1:
                h = jnp.maximum(h, 0.0)
        return h[:, 0]

    num_q = len(heads) // 2
    q1 = [run(layers) for layers in heads[:num_q]]
    q2 = [run(layers) for layers in heads[num_q:]]
    return q1, q2


# TODO(synk): loss() / vect_predict() are trivial reductions over the forward
# outputs; they are left to plain JAX (no kernel benefit).

if __name__ == "__main__":
    key = jax.random.PRNGKey(0)
    k_obs, k_act, k_par = jax.random.split(key, 3)

    batch, obs_dim, act_dim = 64, 16, 16
    hidden_sizes = (32, 32)
    num_q = 2

    obs = jax.random.normal(k_obs, (batch, obs_dim), jnp.float32)
    act = jax.random.normal(k_act, (batch, act_dim), jnp.float32)
    heads = init_ensemble_params(k_par, obs_dim, act_dim, hidden_sizes, num_q)

    fwd = jax.jit(ensemble_double_q_forward)
    q1_list, q2_list = jax.block_until_ready(fwd(obs, act, heads))
    q1_ref, q2_ref = ensemble_double_q_ref(obs, act, heads)

    assert len(q1_list) == num_q and len(q2_list) == num_q
    for q, r in zip(q1_list + q2_list, q1_ref + q2_ref):
        assert q.shape == (batch,), q.shape
        assert jnp.allclose(q, r, atol=1e-4, rtol=1e-4), (q, r)
    print("KERNEL_OK")
</pallas_src>

<mosaic_0001>
module attributes {stable_mosaic.version = 11 : i64} {
  func.func @kernel(%arg0: i32, %arg1: memref<32x128xf32, #tpu.memory_space<vmem>>, %arg2: memref<128x32xf32, #tpu.memory_space<vmem>>, %arg3: memref<128x1xf32, #tpu.memory_space<vmem>>, %arg4: memref<128x128xf32, #tpu.memory_space<vmem>>, %arg5: memref<128x1xf32, #tpu.memory_space<vmem>>, %arg6: memref<8x128xf32, #tpu.memory_space<vmem>>, %arg7: memref<8x1xf32, #tpu.memory_space<vmem>>, %arg8: memref<8x128xf32, #tpu.memory_space<vmem>>) attributes {dimension_semantics = [#tpu.dimension_semantics<parallel>], iteration_bounds = array<i64: 1>, scalar_prefetch = 0 : i64, scratch_operands = 0 : i64, tpu.core_type = #tpu.core_type<tc>, window_params = [{transform_indices = @transform_0, window_bounds = array<i64: 32, 128>}, {pipeline_mode = #tpu.pipeline_mode<synchronous>, transform_indices = @transform_1, window_bounds = array<i64: 128, 32>}, {pipeline_mode = #tpu.pipeline_mode<synchronous>, transform_indices = @transform_2, window_bounds = array<i64: 128, 1>}, {pipeline_mode = #tpu.pipeline_mode<synchronous>, transform_indices = @transform_3, window_bounds = array<i64: 128, 128>}, {pipeline_mode = #tpu.pipeline_mode<synchronous>, transform_indices = @transform_4, window_bounds = array<i64: 128, 1>}, {pipeline_mode = #tpu.pipeline_mode<synchronous>, transform_indices = @transform_5, window_bounds = array<i64: 8, 128>}, {pipeline_mode = #tpu.pipeline_mode<synchronous>, transform_indices = @transform_6, window_bounds = array<i64: 8, 1>}, {transform_indices = @transform_7, window_bounds = array<i64: 8, 128>}]} {
    %c0 = arith.constant 0 : index
    %c0_0 = arith.constant 0 : index
    %0 = vector.load %arg2[%c0, %c0_0] : memref<128x32xf32, #tpu.memory_space<vmem>>, vector<128x32xf32>
    %c0_1 = arith.constant 0 : index
    %c0_2 = arith.constant 0 : index
    %1 = vector.load %arg1[%c0_1, %c0_2] : memref<32x128xf32, #tpu.memory_space<vmem>>, vector<32x128xf32>
    %cst = arith.constant dense<0.000000e+00> : vector<128x128xf32>
    %2 = tpu.matmul %0, %1, %cst {dimension_numbers = #tpu.dot_dimension_numbers<[1], [0], [0], [1], [0, 0, 1, 1], [], []>} : vector<128x32xf32>, vector<32x128xf32>, vector<128x128xf32> -> vector<128x128xf32>
    %c0_3 = arith.constant 0 : index
    %c0_4 = arith.constant 0 : index
    %3 = vector.load %arg3[%c0_3, %c0_4] : memref<128x1xf32, #tpu.memory_space<vmem>>, vector<128x1xf32>
    %4 = vector.broadcast %3 : vector<128x1xf32> to vector<128x128xf32>
    %5 = arith.addf %2, %4 : vector<128x128xf32>
    %cst_5 = arith.constant 0.000000e+00 : f32
    %6 = vector.broadcast %cst_5 : f32 to vector<128x128xf32>
    %7 = arith.maximumf %5, %6 : vector<128x128xf32>
    %c0_6 = arith.constant 0 : index
    %c0_7 = arith.constant 0 : index
    %8 = vector.load %arg4[%c0_6, %c0_7] : memref<128x128xf32, #tpu.memory_space<vmem>>, vector<128x128xf32>
    %cst_8 = arith.constant dense<0.000000e+00> : vector<128x128xf32>
    %9 = tpu.matmul %8, %7, %cst_8 {dimension_numbers = #tpu.dot_dimension_numbers<[1], [0], [0], [1], [0, 0, 1, 1], [], []>} : vector<128x128xf32>, vector<128x128xf32>, vector<128x128xf32> -> vector<128x128xf32>
    %c0_9 = arith.constant 0 : index
    %c0_10 = arith.constant 0 : index
    %10 = vector.load %arg5[%c0_9, %c0_10] : memref<128x1xf32, #tpu.memory_space<vmem>>, vector<128x1xf32>
    %11 = vector.broadcast %10 : vector<128x1xf32> to vector<128x128xf32>
    %12 = arith.addf %9, %11 : vector<128x128xf32>
    %cst_11 = arith.constant 0.000000e+00 : f32
    %13 = vector.broadcast %cst_11 : f32 to vector<128x128xf32>
    %14 = arith.maximumf %12, %13 : vector<128x128xf32>
    %c0_12 = arith.constant 0 : index
    %c0_13 = arith.constant 0 : index
    %15 = vector.load %arg6[%c0_12, %c0_13] : memref<8x128xf32, #tpu.memory_space<vmem>>, vector<8x128xf32>
    %cst_14 = arith.constant dense<0.000000e+00> : vector<8x128xf32>
    %16 = tpu.matmul %15, %14, %cst_14 {dimension_numbers = #tpu.dot_dimension_numbers<[1], [0], [0], [1], [0, 0, 1, 1], [], []>} : vector<8x128xf32>, vector<128x128xf32>, vector<8x128xf32> -> vector<8x128xf32>
    %c0_15 = arith.constant 0 : index
    %c0_16 = arith.constant 0 : index
    %17 = vector.load %arg7[%c0_15, %c0_16] : memref<8x1xf32, #tpu.memory_space<vmem>>, vector<8x1xf32>
    %18 = vector.broadcast %17 : vector<8x1xf32> to vector<8x128xf32>
    %19 = arith.addf %16, %18 : vector<8x128xf32>
    %c0_17 = arith.constant 0 : index
    %c0_18 = arith.constant 0 : index
    %20 = vector.load %arg8[%c0_17, %c0_18] : memref<8x128xf32, #tpu.memory_space<vmem>>, vector<8x128xf32>
    tpu.vector_store %arg8[%c0_17, %c0_18], %19 {strides = array<i32>} : memref<8x128xf32, #tpu.memory_space<vmem>>, vector<8x128xf32>,
    return
  }
  func.func @transform_0(%arg0: i32) -> (i32, i32) {
    %c0_i32 = arith.constant 0 : i32
    %c0_i32_0 = arith.constant 0 : i32
    return %c0_i32, %arg0 : i32, i32
  }
  func.func @transform_1(%arg0: i32) -> (i32, i32) {
    %c0_i32 = arith.constant 0 : i32
    %c0_i32_0 = arith.constant 0 : i32
    %c0_i32_1 = arith.constant 0 : i32
    return %c0_i32, %c0_i32_0 : i32, i32
  }
  func.func @transform_2(%arg0: i32) -> (i32, i32) {
    %c0_i32 = arith.constant 0 : i32
    %c0_i32_0 = arith.constant 0 : i32
    %c0_i32_1 = arith.constant 0 : i32
    return %c0_i32, %c0_i32_0 : i32, i32
  }
  func.func @transform_3(%arg0: i32) -> (i32, i32) {
    %c0_i32 = arith.constant 0 : i32
    %c0_i32_0 = arith.constant 0 : i32
    %c0_i32_1 = arith.constant 0 : i32
    return %c0_i32, %c0_i32_0 : i32, i32
  }
  func.func @transform_4(%arg0: i32) -> (i32, i32) {
    %c0_i32 = arith.constant 0 : i32
    %c0_i32_0 = arith.constant 0 : i32
    %c0_i32_1 = arith.constant 0 : i32
    return %c0_i32, %c0_i32_0 : i32, i32
  }
  func.func @transform_5(%arg0: i32) -> (i32, i32) {
    %c0_i32 = arith.constant 0 : i32
    %c0_i32_0 = arith.constant 0 : i32
    %c0_i32_1 = arith.constant 0 : i32
    return %c0_i32, %c0_i32_0 : i32, i32
  }
  func.func @transform_6(%arg0: i32) -> (i32, i32) {
    %c0_i32 = arith.constant 0 : i32
    %c0_i32_0 = arith.constant 0 : i32
    %c0_i32_1 = arith.constant 0 : i32
    return %c0_i32, %c0_i32_0 : i32, i32
  }
  func.func @transform_7(%arg0: i32) -> (i32, i32) {
    %c0_i32 = arith.constant 0 : i32
    %c0_i32_0 = arith.constant 0 : i32
    return %c0_i32, %arg0 : i32, i32
  }
}

</mosaic_0001>

<bundles_post_ra>
// kernel: ensemble_double_q_forward.1
= control target key start
LH: loop header
LB: loop body
LE: loop exit
PB: predicated region body
PF: predicated region fallthrough
CT: control target
= control target key end

     0   :  { %vm142_vm0 = vcmask 261120   ;;  %v985_v3 = vmov 0   ;;  %vm987_vm1 = vmmov 0   ;;  %s1266_s0 = inlined_call_operand.vmem [shape: f32[32,128], index: 0, kind: input, shape index: {}]   ;;  %s1267_s1 = inlined_call_operand.vmem [shape: f32[128,32], index: 1, kind: input, shape index: {}]   ;;  %s1268_s2 = inlined_call_operand.vmem [shape: f32[128,1], index: 2, kind: input, shape index: {}]   ;;  %s1269_s4 = inlined_call_operand.vmem [shape: f32[128,1], index: 4, kind: input, shape index: {}]   ;;  %s1270_s6 = inlined_call_operand.vmem [shape: f32[8,1], index: 6, kind: input, shape index: {}]   ;;  %s1271_s3 = inlined_call_operand.vmem [shape: f32[128,128], index: 3, kind: input, shape index: {}]   ;;  %s1272_s5 = inlined_call_operand.vmem [shape: f32[8,128], index: 5, kind: input, shape index: {}]   ;;  %s1273_s7 = inlined_call_operand.vmem [shape: f32[8,128], index: 7, kind: output, shape index: {}]  }
   0x1   :  { %v42_v0 = vld [vmem:[%s1266_s0] sm:$0xff]  ;;  %v43_v1 = vld [vmem:[%s1266_s0 + $0x8] sm:$0xff]  ;;  %v44_v2 = vld [vmem:[%s1266_s0 + $0x10] sm:$0xff]  ;;  %983 = vset.pattern.permute.xlu0 %v985_v3  ;;  %984 = vset.pattern.permute.xlu1 %v985_v3 }
   0x2   :  { %v915_v4 = vpack.c.bf16 %v43_v1, %v42_v0  ;;  %v45_v5 = vld [vmem:[%s1266_s0 + $0x18] sm:$0xff]  ;;  %v26_v6 = vld [vmem:[%s1267_s1] sm:$0xff]  ;;  %v47_v9 = vld [vmem:[%s1268_s2 + $0x8] sm:$0xff] }
   0x3   :  { %v919_v7 = vpack.c.bf16 %v45_v5, %v44_v2  ;;  %800 = vmatprep.mubr.msk.f32.mxu0 %vm142_vm0, %v26_v6  ;;  %v46_v8 = vld [vmem:[%s1268_s2] sm:$0xff]  ;;  %v48_v10 = vld [vmem:[%s1268_s2 + $0x10] sm:$0xff]  ;;  %v27_v11 = vld [vmem:[%s1267_s1 + $0x8] sm:$0xff] }
   0x4   :  { %916 = vmatprep.subr.bf16.mxu0 %v915_v4  ;;  %64 = vperm.xlu0 %983, %v46_v8   ;;  %v49_v12 = vld [vmem:[%s1268_s2 + $0x18] sm:$0xff]  ;;  %v28_v13 = vld [vmem:[%s1267_s1 + $0x10] sm:$0xff]  ;;  %v50_v14 = vld [vmem:[%s1268_s2 + $0x20] sm:$0xff] }
   0x5   :  { %918 = vmatpush3.bf16.msra.mxu0 %v915_v4  ;;  %74 = vperm.xlu1 %984, %v48_v10   ;;  %v29_v15 = vld [vmem:[%s1267_s1 + $0x18] sm:$0xff]  ;;  %v51_v16 = vld [vmem:[%s1268_s2 + $0x28] sm:$0xff]  ;;  %v30_v17 = vld [vmem:[%s1267_s1 + $0x20] sm:$0xff] }
   0x6   :  { %920 = vmatprep.subr.bf16.mxu0 %v919_v7  ;;  %v52_v18 = vld [vmem:[%s1268_s2 + $0x30] sm:$0xff]  ;;  %v31_v19 = vld [vmem:[%s1267_s1 + $0x28] sm:$0xff]  ;;  %v53_v20 = vld [vmem:[%s1268_s2 + $0x38] sm:$0xff] }
   0x7   :  { %v32_v21 = vld [vmem:[%s1267_s1 + $0x30] sm:$0xff]  ;;  %v54_v22 = vld [vmem:[%s1268_s2 + $0x40] sm:$0xff]  ;;  %v33_v23 = vld [vmem:[%s1267_s1 + $0x38] sm:$0xff] }
   0x8   :  { %69 = vperm.xlu0 %983, %v47_v9   ;;  %v55_v24 = vld [vmem:[%s1268_s2 + $0x48] sm:$0xff]  ;;  %v34_v25 = vld [vmem:[%s1267_s1 + $0x40] sm:$0xff]  ;;  %v56_v26 = vld [vmem:[%s1268_s2 + $0x50] sm:$0xff] }
   0x9   :  { %922 = vmatpush3.bf16.msra.mxu0 %v919_v7  ;;  %79 = vperm.xlu1 %984, %v49_v12   ;;  %v35_v27 = vld [vmem:[%s1267_s1 + $0x48] sm:$0xff]  ;;  %v57_v28 = vld [vmem:[%s1268_s2 + $0x58] sm:$0xff]  ;;  %v36_v29 = vld [vmem:[%s1267_s1 + $0x50] sm:$0xff] }
   0xa   :  { %v58_v30 = vld [vmem:[%s1268_s2 + $0x60] sm:$0xff]  ;;  %v37_v31 = vld [vmem:[%s1267_s1 + $0x58] sm:$0xff]  ;;  %v59_v32 = vld [vmem:[%s1268_s2 + $0x68] sm:$0xff] }
   0xb   :  { %v38_v33 = vld [vmem:[%s1267_s1 + $0x60] sm:$0xff]  ;;  %v60_v34 = vld [vmem:[%s1268_s2 + $0x70] sm:$0xff]  ;;  %v39_v35 = vld [vmem:[%s1267_s1 + $0x68] sm:$0xff] }
   0xc   :  { %801 = vmatmul.mubr.msk.f32.vlgmr.msra.gmra.mrb[0].mxu0 %vm142_vm0, %v27_v11  ;;  %84 = vperm.xlu0 %983, %v50_v14   ;;  %v61_v36 = vld [vmem:[%s1268_s2 + $0x78] sm:$0xff]  ;;  %v40_v37 = vld [vmem:[%s1267_s1 + $0x70] sm:$0xff]  ;;  %v368_v38 = vld [vmem:[%s1269_s4] sm:$0xff] }
   0xd   :  { %803 = vmatprep.mubr.msk.f32.mxu0 %vm142_vm0, %v28_v13  ;;  %89 = vperm.xlu1 %984, %v51_v16   ;;  %v41_v39 = vld [vmem:[%s1267_s1 + $0x78] sm:$0xff]  ;;  %v369_v40 = vld [vmem:[%s1269_s4 + $0x8] sm:$0xff]  ;;  %v370_v41 = vld [vmem:[%s1269_s4 + $0x10] sm:$0xff] }
   0xe   :  { %v371_v42 = vld [vmem:[%s1269_s4 + $0x18] sm:$0xff]  ;;  %v372_v43 = vld [vmem:[%s1269_s4 + $0x20] sm:$0xff]  ;;  %v373_v44 = vld [vmem:[%s1269_s4 + $0x28] sm:$0xff] }
   0xf   :  { %v374_v45 = vld [vmem:[%s1269_s4 + $0x30] sm:$0xff]  ;;  %v375_v46 = vld [vmem:[%s1269_s4 + $0x38] sm:$0xff]  ;;  %v376_v47 = vld [vmem:[%s1269_s4 + $0x40] sm:$0xff] }
  0x10   :  { %804 = vmatmul.mubr.msk.f32.gmra.mrb[2].mxu0 %vm142_vm0, %v29_v15  ;;  %94 = vperm.xlu0 %983, %v52_v18   ;;  %v377_v48 = vld [vmem:[%s1269_s4 + $0x48] sm:$0xff]  ;;  %v378_v49 = vld [vmem:[%s1269_s4 + $0x50] sm:$0xff]  ;;  %v379_v50 = vld [vmem:[%s1269_s4 + $0x58] sm:$0xff] }
  0x11   :  { %806 = vmatprep.mubr.msk.f32.mxu0 %vm142_vm0, %v30_v17  ;;  %99 = vperm.xlu1 %984, %v53_v20   ;;  %v380_v51 = vld [vmem:[%s1269_s4 + $0x60] sm:$0xff]  ;;  %v381_v52 = vld [vmem:[%s1269_s4 + $0x68] sm:$0xff]  ;;  %v382_v53 = vld [vmem:[%s1269_s4 + $0x70] sm:$0xff] }
  0x12   :  { %v383_v54 = vld [vmem:[%s1269_s4 + $0x78] sm:$0xff]  ;;  %v626_v55 = vld [vmem:[%s1270_s6] sm:$0xff] }
  0x13   :  { %v352_v56 = vld [vmem:[%s1271_s3] sm:$0xff] }
  0x14   :  { %807 = vmatmul.mubr.msk.f32.gmra.mrb[4].mxu0 %vm142_vm0, %v31_v19  ;;  %104 = vperm.xlu0 %983, %v54_v22  }
  0x15   :  { %809 = vmatprep.mubr.msk.f32.mxu0 %vm142_vm0, %v32_v21  ;;  %109 = vperm.xlu1 %984, %v55_v24  }
  0x16   :  { %856 = vmatprep.mubr.f32.mxu1 %v352_v56 }
  0x18   :  { %810 = vmatmul.mubr.msk.f32.gmra.mrb[6].mxu0 %vm142_vm0, %v33_v23  ;;  %114 = vperm.xlu0 %983, %v56_v26  }
  0x19   :  { %812 = vmatprep.mubr.msk.f32.mxu0 %vm142_vm0, %v34_v25  ;;  %119 = vperm.xlu1 %984, %v57_v28  }
  0x1c   :  { %813 = vmatmul.mubr.msk.f32.gmra.mrb[8].mxu0 %vm142_vm0, %v35_v27  ;;  %124 = vperm.xlu0 %983, %v58_v30  }
  0x1d   :  { %815 = vmatprep.mubr.msk.f32.mxu0 %vm142_vm0, %v36_v29  ;;  %129 = vperm.xlu1 %984, %v59_v32  }
  0x20   :  { %816 = vmatmul.mubr.msk.f32.gmra.mrb[10].mxu0 %vm142_vm0, %v37_v31  ;;  %134 = vperm.xlu0 %983, %v60_v34  }
  0x21   :  { %818 = vmatprep.mubr.msk.f32.mxu0 %vm142_vm0, %v38_v33  ;;  %139 = vperm.xlu1 %984, %v61_v36  }
  0x24   :  { %819 = vmatmul.mubr.msk.f32.gmra.mrb[12].mxu0 %vm142_vm0, %v39_v35  ;;  %386 = vperm.xlu0 %983, %v368_v38  }
  0x25   :  { %821 = vmatprep.mubr.msk.f32.mxu0 %vm142_vm0, %v40_v37  ;;  %391 = vperm.xlu1 %984, %v369_v40  }
  0x28   :  { %822 = vmatmul.mubr.msk.f32.gmra.mrb[14].mxu0 %vm142_vm0, %v41_v39  ;;  %396 = vperm.xlu0 %983, %v370_v41  }
  0x29   :  { %401 = vperm.xlu1 %984, %v371_v42  }
  0x2c   :  { %406 = vperm.xlu0 %983, %v372_v43  }
  0x2d   :  { %411 = vperm.xlu1 %984, %v373_v44  }
  0x30   :  { %416 = vperm.xlu0 %983, %v374_v45  }
  0x31   :  { %421 = vperm.xlu1 %984, %v375_v46  }
  0x34   :  { %426 = vperm.xlu0 %983, %v376_v47  }
  0x35   :  { %431 = vperm.xlu1 %984, %v377_v48  }
  0x38   :  { %436 = vperm.xlu0 %983, %v378_v49  }
  0x39   :  { %441 = vperm.xlu1 %984, %v379_v50  }
  0x3c   :  { %446 = vperm.xlu0 %983, %v380_v51  }
  0x3d   :  { %451 = vperm.xlu1 %984, %v381_v52  }
  0x40   :  { %456 = vperm.xlu0 %983, %v382_v53  }
  0x41   :  { %461 = vperm.xlu1 %984, %v383_v54  }
  0x44   :  { %629 = vperm.xlu0 %983, %v626_v55  }
  0x83   :  { %v65_v58 = vpop.permute.xlu0 %64 }
  0x84   :  { %v75_v57 = vpop.permute.xlu1 %74 }
  0x87   :  { %v70_v60 = vpop.permute.xlu0 %69 }
  0x88   :  { %v80_v59 = vpop.permute.xlu1 %79 }
  0x8b   :  { %v85_v62 = vpop.permute.xlu0 %84 }
  0x8c   :  { %v90_v61 = vpop.permute.xlu1 %89 }
  0x8f   :  { %v95_v7 = vpop.permute.xlu0 %94 }
  0x90   :  { %v100_v4 = vpop.permute.xlu1 %99 }
  0x93   :  { %v105_v20 = vpop.permute.xlu0 %104 }
  0x94   :  { %v110_v17 = vpop.permute.xlu1 %109 }
  0x97   :  { %v115_v32 = vpop.permute.xlu0 %114 }
  0x98   :  { %v120_v29 = vpop.permute.xlu1 %119 }
  0x9b   :  { %v125_v45 = vpop.permute.xlu0 %124 }
  0x9c   :  { %v130_v42 = vpop.permute.xlu1 %129 }
  0xa0   :  { %v140_v54 = vpop.permute.xlu1 %139 }
  0xdf   :  { %v802_v63 = vpop.f32.mrb[0].mxu0 }
  0xe0   :  { %v263_v0 = vadd.f32 %v802_v63, %v70_v60  ;;  %v257_v1 = vpop.f32.mrb[1].mxu0 }
  0xe1   :  { %v258_v2 = vadd.f32 %v257_v1, %v65_v58  ;;  %v353_v1 = vld [vmem:[%s1271_s3 + $0x8] sm:$0xff] }
  0xe2   :  { %v337_v3 = vmax.f32 %v263_v0, 0.0 }
  0xe3   :  { %v336_v5 = vmax.f32 %v258_v2, 0.0  ;;  %v805_v6 = vpop.f32.mrb[2].mxu0  ;;  %v354_v2 = vld [vmem:[%s1271_s3 + $0x10] sm:$0xff] }
  0xe4   :  { %v273_v8 = vadd.f32 %v805_v6, %v80_v59  ;;  %v267_v9 = vpop.f32.mrb[3].mxu0  ;;  %v358_v6 = vld [vmem:[%s1271_s3 + $0x30] sm:$0xff] }
  0xe5   :  { %v268_v10 = vadd.f32 %v267_v9, %v75_v57  ;;  %v923_v11 = vpack.c.bf16 %v337_v3, %v336_v5  ;;  %v135_v57 = vpop.permute.xlu0 %134  ;;  %v355_v3 = vld [vmem:[%s1271_s3 + $0x18] sm:$0xff]  ;;  %v357_v5 = vld [vmem:[%s1271_s3 + $0x28] sm:$0xff] }
  0xe6   :  { %v339_v12 = vmax.f32 %v273_v8, 0.0  ;;  %v360_v8 = vld [vmem:[%s1271_s3 + $0x40] sm:$0xff]  ;;  %v361_v9 = vld [vmem:[%s1271_s3 + $0x48] sm:$0xff] }
  0xe7   :  { %v338_v13 = vmax.f32 %v268_v10, 0.0  ;;  %v808_v14 = vpop.f32.mrb[4].mxu0  ;;  %924 = vmatprep.subr.bf16.mxu1 %v923_v11  ;;  %v362_v10 = vld [vmem:[%s1271_s3 + $0x50] sm:$0xff] }
  0xe8   :  { %v283_v15 = vadd.f32 %v808_v14, %v90_v61  ;;  %v277_v16 = vpop.f32.mrb[5].mxu0  ;;  %926 = vmatpush3.bf16.msra.mxu1 %v923_v11  ;;  %v363_v11 = vld [vmem:[%s1271_s3 + $0x58] sm:$0xff]  ;;  %v366_v14 = vld [vmem:[%s1271_s3 + $0x70] sm:$0xff] }
  0xe9   :  { %v927_v18 = vpack.c.bf16 %v339_v12, %v338_v13  ;;  %v278_v19 = vadd.f32 %v277_v16, %v85_v62  ;;  %v364_v12 = vld [vmem:[%s1271_s3 + $0x60] sm:$0xff]  ;;  %v365_v13 = vld [vmem:[%s1271_s3 + $0x68] sm:$0xff]  ;;  %v986_v16 = vmov 0.0|0.0  }
  0xea   :  { %v341_v21 = vmax.f32 %v283_v15, 0.0  ;;  %v367_v15 = vld [vmem:[%s1271_s3 + $0x78] sm:$0xff]  ;;  %955 = vmatprep.subr.bf16.mxu0 %v986_v16 }
  0xeb   :  { %v340_v22 = vmax.f32 %v278_v19, 0.0  ;;  %v811_v23 = vpop.f32.mrb[6].mxu0  ;;  %928 = vmatprep.subr.bf16.mxu1 %v927_v18  ;;  %v387_v19 = vpop.permute.xlu0 %386 }
  0xec   :  { %v293_v24 = vadd.f32 %v811_v23, %v100_v4  ;;  %v287_v25 = vpop.f32.mrb[7].mxu0  ;;  %930 = vmatpush3.bf16.msra.mxu1 %v927_v18  ;;  %v356_v4 = vld [vmem:[%s1271_s3 + $0x20] sm:$0xff]  ;;  %v392_v18 = vpop.permute.xlu1 %391 }
  0xed   :  { %v931_v26 = vpack.c.bf16 %v341_v21, %v340_v22  ;;  %v288_v27 = vadd.f32 %v287_v25, %v95_v7  ;;  %v359_v7 = vld [vmem:[%s1271_s3 + $0x38] sm:$0xff] }
  0xee   :  { %v343_v28 = vmax.f32 %v293_v24, 0.0 }
  0xef   :  { %v342_v30 = vmax.f32 %v288_v27, 0.0  ;;  %v814_v31 = vpop.f32.mrb[8].mxu0  ;;  %932 = vmatprep.subr.bf16.mxu1 %v931_v26  ;;  %v397_v21 = vpop.permute.xlu0 %396 }
  0xf0   :  { %v303_v33 = vadd.f32 %v814_v31, %v110_v17  ;;  %v297_v34 = vpop.f32.mrb[9].mxu0  ;;  %934 = vmatpush3.bf16.msra.mxu1 %v931_v26  ;;  %v988_v17 = vmov 0.0  }
  0xf1   :  { %v935_v35 = vpack.c.bf16 %v343_v28, %v342_v30  ;;  %v298_v36 = vadd.f32 %v297_v34, %v105_v20  ;;  %912 = vmatprep.mubr.msk.f32.mxu0 %vm987_vm1, %v988_v17  ;;  %v402_v20 = vpop.permute.xlu1 %401 }
  0xf2   :  { %v345_v37 = vmax.f32 %v303_v33, 0.0 }
  0xf3   :  { %v344_v38 = vmax.f32 %v298_v36, 0.0  ;;  %v817_v39 = vpop.f32.mrb[10].mxu0  ;;  %936 = vmatprep.subr.bf16.mxu1 %v935_v35  ;;  %v407_v23 = vpop.permute.xlu0 %406 }
  0xf4   :  { %v313_v40 = vadd.f32 %v817_v39, %v120_v29  ;;  %v307_v41 = vpop.f32.mrb[11].mxu0  ;;  %938 = vmatpush3.bf16.msra.mxu1 %v935_v35 }
  0xf5   :  { %v939_v43 = vpack.c.bf16 %v345_v37, %v344_v38  ;;  %v308_v44 = vadd.f32 %v307_v41, %v115_v32  ;;  %v412_v22 = vpop.permute.xlu1 %411 }
  0xf6   :  { %v347_v46 = vmax.f32 %v313_v40, 0.0 }
  0xf7   :  { %v346_v47 = vmax.f32 %v308_v44, 0.0  ;;  %v820_v48 = vpop.f32.mrb[12].mxu0  ;;  %940 = vmatprep.subr.bf16.mxu1 %v939_v43  ;;  %v417_v32 = vpop.permute.xlu0 %416 }
  0xf8   :  { %v323_v49 = vadd.f32 %v820_v48, %v130_v42  ;;  %v317_v50 = vpop.f32.mrb[13].mxu0  ;;  %942 = vmatpush3.bf16.msra.mxu1 %v939_v43 }
  0xf9   :  { %v943_v51 = vpack.c.bf16 %v347_v46, %v346_v47  ;;  %v318_v52 = vadd.f32 %v317_v50, %v125_v45  ;;  %v422_v29 = vpop.permute.xlu1 %421 }
  0xfa   :  { %v349_v53 = vmax.f32 %v323_v49, 0.0 }
  0xfb   :  { %v348_v55 = vmax.f32 %v318_v52, 0.0  ;;  %v823_v56 = vpop.f32.mrb[14].mxu0  ;;  %944 = vmatprep.subr.bf16.mxu1 %v943_v51  ;;  %v427_v45 = vpop.permute.xlu0 %426 }
  0xfc   :  { %v333_v58 = vadd.f32 %v823_v56, %v140_v54  ;;  %v327_v59 = vpop.f32.mrb[15].mxu0  ;;  %946 = vmatpush3.bf16.msra.mxu1 %v943_v51 }
  0xfd   :  { %v947_v60 = vpack.c.bf16 %v349_v53, %v348_v55  ;;  %v328_v61 = vadd.f32 %v327_v59, %v135_v57  ;;  %v432_v42 = vpop.permute.xlu1 %431 }
  0xfe   :  { %v351_v62 = vmax.f32 %v333_v58, 0.0 }
  0xff   :  { %v350_v63 = vmax.f32 %v328_v61, 0.0  ;;  %948 = vmatprep.subr.bf16.mxu1 %v947_v60  ;;  %v437_v57 = vpop.permute.xlu0 %436 }
 0x100   :  { %950 = vmatpush3.bf16.msra.mxu1 %v947_v60 }
 0x101   :  { %v951_v0 = vpack.c.bf16 %v351_v62, %v350_v63  ;;  %v442_v54 = vpop.permute.xlu1 %441 }
 0x103   :  { %952 = vmatprep.subr.bf16.mxu1 %v951_v0 }
 0x104   :  { %954 = vmatpush3.bf16.msra.mxu1 %v951_v0 }
 0x107   :  { %857 = vmatmul.mubr.f32.vlgmr.msra.gmra.mrb[0].mxu1 %v353_v1 }
 0x108   :  { %859 = vmatprep.mubr.f32.mxu1 %v354_v2 }
 0x10b   :  { %860 = vmatmul.mubr.f32.gmra.mrb[2].mxu1 %v355_v3  ;;  %v452_v3 = vpop.permute.xlu1 %451 }
 0x10c   :  { %862 = vmatprep.mubr.f32.mxu1 %v356_v4 }
 0x10f   :  { %863 = vmatmul.mubr.f32.gmra.mrb[4].mxu1 %v357_v5 }
 0x110   :  { %865 = vmatprep.mubr.f32.mxu1 %v358_v6  ;;  %v447_v6 = vpop.permute.xlu0 %446 }
 0x113   :  { %866 = vmatmul.mubr.f32.gmra.mrb[6].mxu1 %v359_v7 }
 0x114   :  { %868 = vmatprep.mubr.f32.mxu1 %v360_v8 }
 0x117   :  { %869 = vmatmul.mubr.f32.gmra.mrb[8].mxu1 %v361_v9 }
 0x118   :  { %871 = vmatprep.mubr.f32.mxu1 %v362_v10 }
 0x11b   :  { %872 = vmatmul.mubr.f32.gmra.mrb[10].mxu1 %v363_v11 }
 0x11c   :  { %874 = vmatprep.mubr.f32.mxu1 %v364_v12 }
 0x11f   :  { %875 = vmatmul.mubr.f32.gmra.mrb[12].mxu1 %v365_v13 }
 0x120   :  { %877 = vmatprep.mubr.f32.mxu1 %v366_v14 }
 0x123   :  { %878 = vmatmul.mubr.f32.gmra.mrb[14].mxu1 %v367_v15  ;;  %v462_v15 = vpop.permute.xlu1 %461 }
 0x1da   :  { %v858_v24 = vpop.f32.mrb[0].mxu1 }
 0x1db   :  { %v536_v25 = vadd.f32 %v858_v24, %v392_v18  ;;  %v530_v26 = vpop.f32.mrb[1].mxu1 }
 0x1dc   :  { %v531_v27 = vadd.f32 %v530_v26, %v387_v19  ;;  %v457_v19 = vpop.permute.xlu0 %456 }
 0x1dd   :  { %v610_v28 = vmax.f32 %v536_v25, 0.0 }
 0x1de   :  { %v609_v30 = vmax.f32 %v531_v27, 0.0  ;;  %v861_v31 = vpop.f32.mrb[2].mxu1  ;;  %v625_v27 = vld [vmem:[%s1272_s5] sm:$0xff] }
 0x1df   :  { %v546_v33 = vadd.f32 %v861_v31, %v402_v20  ;;  %v540_v34 = vpop.f32.mrb[3].mxu1 }
 0x1e0   :  { %v956_v35 = vpack.c.bf16 %v610_v28, %v609_v30  ;;  %v541_v36 = vadd.f32 %v540_v34, %v397_v21  ;;  %v630_v28 = vpop.permute.xlu0 %629 }
 0x1e1   :  { %v612_v37 = vmax.f32 %v546_v33, 0.0 }
 0x1e2   :  { %v611_v38 = vmax.f32 %v541_v36, 0.0  ;;  %v864_v39 = vpop.f32.mrb[4].mxu1  ;;  %957 = vmatpush3.bf16.msra.mxu0 %v956_v35 }
 0x1e3   :  { %v556_v40 = vadd.f32 %v864_v39, %v412_v22  ;;  %v550_v41 = vpop.f32.mrb[5].mxu1  ;;  %958 = vmatprep.subr.bf16.mxu0 %v986_v16 }
 0x1e4   :  { %v959_v43 = vpack.c.bf16 %v612_v37, %v611_v38  ;;  %v551_v44 = vadd.f32 %v550_v41, %v407_v23 }
 0x1e5   :  { %v614_v46 = vmax.f32 %v556_v40, 0.0 }
 0x1e6   :  { %v613_v47 = vmax.f32 %v551_v44, 0.0  ;;  %v867_v48 = vpop.f32.mrb[6].mxu1  ;;  %960 = vmatpush3.bf16.msra.mxu0 %v959_v43 }
 0x1e7   :  { %v566_v49 = vadd.f32 %v867_v48, %v422_v29  ;;  %v560_v50 = vpop.f32.mrb[7].mxu1  ;;  %961 = vmatprep.subr.bf16.mxu0 %v986_v16 }
 0x1e8   :  { %v962_v51 = vpack.c.bf16 %v614_v46, %v613_v47  ;;  %v561_v52 = vadd.f32 %v560_v50, %v417_v32 }
 0x1e9   :  { %v616_v53 = vmax.f32 %v566_v49, 0.0 }
 0x1ea   :  { %v615_v55 = vmax.f32 %v561_v52, 0.0  ;;  %v870_v56 = vpop.f32.mrb[8].mxu1  ;;  %963 = vmatpush3.bf16.msra.mxu0 %v962_v51 }
 0x1eb   :  { %v576_v58 = vadd.f32 %v870_v56, %v432_v42  ;;  %v570_v59 = vpop.f32.mrb[9].mxu1  ;;  %964 = vmatprep.subr.bf16.mxu0 %v986_v16 }
 0x1ec   :  { %v965_v60 = vpack.c.bf16 %v616_v53, %v615_v55  ;;  %v571_v61 = vadd.f32 %v570_v59, %v427_v45 }
 0x1ed   :  { %v618_v62 = vmax.f32 %v576_v58, 0.0 }
 0x1ee   :  { %v617_v63 = vmax.f32 %v571_v61, 0.0  ;;  %v873_v0 = vpop.f32.mrb[10].mxu1  ;;  %966 = vmatpush3.bf16.msra.mxu0 %v965_v60 }
 0x1ef   :  { %v586_v1 = vadd.f32 %v873_v0, %v442_v54  ;;  %v580_v2 = vpop.f32.mrb[11].mxu1  ;;  %967 = vmatprep.subr.bf16.mxu0 %v986_v16 }
 0x1f0   :  { %v968_v4 = vpack.c.bf16 %v618_v62, %v617_v63  ;;  %v581_v5 = vadd.f32 %v580_v2, %v437_v57 }
 0x1f1   :  { %v620_v7 = vmax.f32 %v586_v1, 0.0 }
 0x1f2   :  { %v619_v8 = vmax.f32 %v581_v5, 0.0  ;;  %v876_v9 = vpop.f32.mrb[12].mxu1  ;;  %969 = vmatpush3.bf16.msra.mxu0 %v968_v4 }
 0x1f3   :  { %v596_v10 = vadd.f32 %v876_v9, %v452_v3  ;;  %v590_v11 = vpop.f32.mrb[13].mxu1  ;;  %970 = vmatprep.subr.bf16.mxu0 %v986_v16 }
 0x1f4   :  { %v971_v12 = vpack.c.bf16 %v620_v7, %v619_v8  ;;  %v591_v13 = vadd.f32 %v590_v11, %v447_v6 }
 0x1f5   :  { %v622_v14 = vmax.f32 %v596_v10, 0.0 }
 0x1f6   :  { %v621_v17 = vmax.f32 %v591_v13, 0.0  ;;  %v879_v18 = vpop.f32.mrb[14].mxu1  ;;  %972 = vmatpush3.bf16.msra.mxu0 %v971_v12 }
 0x1f7   :  { %v606_v20 = vadd.f32 %v879_v18, %v462_v15  ;;  %v600_v21 = vpop.f32.mrb[15].mxu1  ;;  %973 = vmatprep.subr.bf16.mxu0 %v986_v16 }
 0x1f8   :  { %v974_v22 = vpack.c.bf16 %v622_v14, %v621_v17  ;;  %v601_v23 = vadd.f32 %v600_v21, %v457_v19 }
 0x1f9   :  { %v624_v24 = vmax.f32 %v606_v20, 0.0 }
 0x1fa   :  { %v623_v25 = vmax.f32 %v601_v23, 0.0  ;;  %975 = vmatpush3.bf16.msra.mxu0 %v974_v22 }
 0x1fb   :  { %976 = vmatprep.subr.bf16.mxu0 %v986_v16 }
 0x1fc   :  { %v977_v26 = vpack.c.bf16 %v624_v24, %v623_v25 }
 0x1fe   :  { %978 = vmatpush3.bf16.msra.mxu0 %v977_v26 }
 0x201   :  { %913 = vmatmul.mubr.f32.vlgmr.msra.gmra.mrb[16].mxu0 %v625_v27 }
 0x2d4   :  { %v698_v29 = vpop.f32.mrb[16].mxu0 }
 0x2d5   :  { %v699_v30 = vadd.f32 %v698_v29, %v630_v28  ;;  %v914_v31 = vpop.f32.mrb[17].mxu0 }
 0x2d7   :  { %702 = vst [vmem:[%s1273_s7] sm:$0xff] %v699_v30 }

</bundles_post_ra>
